<compile_context>
chip_gen: v7x
topology: tpu7x:2x2x1
jax: 0.10.0
libtpu: 0.0.40
codegen_flags: <defaults>
</compile_context>

<pallas_src>
import jax
import jax.numpy as jnp
from jax.experimental import pallas as pl
from jax.experimental.pallas import tpu as pltpu


_SPLIT_THRESHOLD_BYTES = 1 << 20   # only force >=2 grid steps above ~1 MiB of output


def _vmem_budgets():
    """Returns (per-step block budget, vmem_limit_bytes), generation aware."""
    try:
        vmem = pltpu.get_tpu_info().vmem_capacity_bytes
    except Exception:                      # unknown backend / interpret mode
        vmem = 64 * 1024 * 1024            # assume the smallest (v7x per-TC)
    if vmem >= 128 * 1024 * 1024:          # v5e / v6e: 128 MiB VMEM
        return 40 * 1024 * 1024, 96 * 1024 * 1024
    return 16 * 1024 * 1024, 32 * 1024 * 1024   # v7x: 64 MiB per TC


def _sublane_pack(itemsize):
    # 8 sublanes of 32-bit; sub-32-bit dtypes pack 2x/4x rows per sublane.
    return max(8, 32 // int(itemsize))


def _round_up(x, m):
    return -(-x // m) * m


def _choose_tiles_3d(bs, seq_length, hidden_dim, itemsize, n_batched, budget, sub):
    """Pick (tile_b, tile_s) so double-buffered pipeline blocks fit `budget`.

    n_batched = number of (tile_b, tile_s, D)-shaped arrays in the pipeline
    (output, plus x for the fused-add kernel).  The (1, tile_s, D) embedding
    block is always counted once.  Factor 2 = double buffering.
    """
    d = hidden_dim * itemsize

    def cost(tb, ts):
        return 2 * ts * d * (1 + n_batched * tb)

    tile_b, tile_s = bs, seq_length
    if cost(tile_b, tile_s) <= budget:
        return tile_b, tile_s

    # Shrink the batch tile FIRST so a huge batch does not collapse the
    # sequence tile to the sublane minimum; target ~512 sequence rows.
    ts_target = min(seq_length, max(sub, (512 // sub) * sub))
    base = 2 * ts_target * d                      # embedding block
    per_b = 2 * ts_target * d * n_batched         # per batch row of batched blocks
    if budget > base + per_b:
        tile_b = max(1, min(bs, int((budget - base) // per_b)))
    else:
        tile_b = 1

    # Largest sequence tile (multiple of the sublane packing) that now fits.
    per_row = 2 * d * (1 + n_batched * tile_b)
    tile_s = min(seq_length, max(sub, (int(budget // per_row) // sub) * sub))
    return tile_b, tile_s


def _maybe_split_seq(tile_s, seq_length, sub, out_bytes):
    """Force >=2 sequence tiles so the parallel axis can shard over v7x's 2 TCs."""
    if out_bytes < _SPLIT_THRESHOLD_BYTES or seq_length < 2 * sub:
        return tile_s
    half = _round_up(-(-seq_length // 2), sub)
    if half < seq_length:
        return min(tile_s, half)
    return tile_s


def _choose_tile_f(bs, flat, itemsize, n_batched, budget):
    per_f = 2 * itemsize * (1 + n_batched * bs)   # double-buffered blocks per lane col
    if flat * per_f <= budget or flat <= 128:
        return flat
    return max(128, (int(budget // per_f) // 128) * 128)


def _maybe_split_flat(tile_f, flat, out_bytes):
    if tile_f < flat or out_bytes < _SPLIT_THRESHOLD_BYTES or flat < 256:
        return tile_f
    half = _round_up(-(-flat // 2), 128)
    return half if half < flat else tile_f


def _flat_path_fits(bs, flat, itemsize, n_batched, budget):
    per_f = 2 * itemsize * (1 + n_batched * bs)
    return min(flat, 128) * per_f <= budget


# ----------------------------- kernels ------------------------------------ #

def _broadcast_kernel(pos_ref, out_ref):
    # pos_ref broadcasts over the batch (leading) axis of out_ref.
    out_ref[...] = jnp.broadcast_to(pos_ref[...], out_ref.shape)


def _add_pos_kernel(x_ref, pos_ref, out_ref):
    # Fused x + positional embedding (pos broadcasts over the batch axis).
    out_ref[...] = (x_ref[...] + pos_ref[...]).astype(out_ref.dtype)


# --------------------------- pallas_call wrappers -------------------------- #

def _broadcast_3d(pos, bs, budget, limit):
    _, seq_length, hidden_dim = pos.shape
    dtype = pos.dtype
    sub = _sublane_pack(dtype.itemsize)
    tile_b, tile_s = _choose_tiles_3d(bs, seq_length, hidden_dim,
                                      dtype.itemsize, 1, budget, sub)
    out_bytes = bs * seq_length * hidden_dim * dtype.itemsize
    if tile_s >= seq_length:
        tile_s = _maybe_split_seq(tile_s, seq_length, sub, out_bytes)
    grid = (pl.cdiv(seq_length, tile_s), pl.cdiv(bs, tile_b))  # batch innermost
    return pl.pallas_call(
        _broadcast_kernel,
        out_shape=jax.ShapeDtypeStruct((bs, seq_length, hidden_dim), dtype),
        grid_spec=pltpu.PrefetchScalarGridSpec(
            num_scalar_prefetch=0,
            grid=grid,
            in_specs=[pl.BlockSpec((1, tile_s, hidden_dim), lambda s, b: (0, s, 0))],
            out_specs=pl.BlockSpec((tile_b, tile_s, hidden_dim),
                                   lambda s, b: (b, s, 0)),
        ),
        compiler_params=pltpu.CompilerParams(
            dimension_semantics=("parallel", "arbitrary"),
            vmem_limit_bytes=limit,
        ),
    )(pos)


def _broadcast_2d(pos_flat, bs, budget, limit):
    # Lane-dense path for hidden_dim % 128 != 0: last dim is S*D.
    flat = pos_flat.shape[1]
    dtype = pos_flat.dtype
    tile_f = _choose_tile_f(bs, flat, dtype.itemsize, 1, budget)
    out_bytes = bs * flat * dtype.itemsize
    tile_f = _maybe_split_flat(tile_f, flat, out_bytes)
    grid = (pl.cdiv(flat, tile_f),)
    return pl.pallas_call(
        _broadcast_kernel,
        out_shape=jax.ShapeDtypeStruct((bs, flat), dtype),
        grid_spec=pltpu.PrefetchScalarGridSpec(
            num_scalar_prefetch=0,
            grid=grid,
            in_specs=[pl.BlockSpec((1, tile_f), lambda f: (0, f))],
            out_specs=pl.BlockSpec((bs, tile_f), lambda f: (0, f)),
        ),
        compiler_params=pltpu.CompilerParams(
            dimension_semantics=("parallel",),
            vmem_limit_bytes=limit,
        ),
    )(pos_flat)


def _add_3d(x, pos, budget, limit):
    bs, seq_length, hidden_dim = x.shape
    dtype = x.dtype
    sub = _sublane_pack(dtype.itemsize)
    tile_b, tile_s = _choose_tiles_3d(bs, seq_length, hidden_dim,
                                      dtype.itemsize, 2, budget, sub)
    out_bytes = bs * seq_length * hidden_dim * dtype.itemsize
    if tile_s >= seq_length:
        tile_s = _maybe_split_seq(tile_s, seq_length, sub, out_bytes)
    grid = (pl.cdiv(seq_length, tile_s), pl.cdiv(bs, tile_b))  # batch innermost
    return pl.pallas_call(
        _add_pos_kernel,
        out_shape=jax.ShapeDtypeStruct((bs, seq_length, hidden_dim), dtype),
        grid_spec=pltpu.PrefetchScalarGridSpec(
            num_scalar_prefetch=0,
            grid=grid,
            in_specs=[
                pl.BlockSpec((tile_b, tile_s, hidden_dim), lambda s, b: (b, s, 0)),
                pl.BlockSpec((1, tile_s, hidden_dim), lambda s, b: (0, s, 0)),
            ],
            out_specs=pl.BlockSpec((tile_b, tile_s, hidden_dim),
                                   lambda s, b: (b, s, 0)),
        ),
        compiler_params=pltpu.CompilerParams(
            dimension_semantics=("parallel", "arbitrary"),
            vmem_limit_bytes=limit,
        ),
    )(x, pos)


def _add_2d(x_flat, pos_flat, budget, limit):
    bs, flat = x_flat.shape
    dtype = x_flat.dtype
    tile_f = _choose_tile_f(bs, flat, dtype.itemsize, 2, budget)
    out_bytes = bs * flat * dtype.itemsize
    tile_f = _maybe_split_flat(tile_f, flat, out_bytes)
    grid = (pl.cdiv(flat, tile_f),)
    return pl.pallas_call(
        _add_pos_kernel,
        out_shape=jax.ShapeDtypeStruct((bs, flat), dtype),
        grid_spec=pltpu.PrefetchScalarGridSpec(
            num_scalar_prefetch=0,
            grid=grid,
            in_specs=[
                pl.BlockSpec((bs, tile_f), lambda f: (0, f)),
                pl.BlockSpec((1, tile_f), lambda f: (0, f)),
            ],
            out_specs=pl.BlockSpec((bs, tile_f), lambda f: (0, f)),
        ),
        compiler_params=pltpu.CompilerParams(
            dimension_semantics=("parallel",),
            vmem_limit_bytes=limit,
        ),
    )(x_flat, pos_flat)


# ------------------------------ public API --------------------------------- #

def learnable_positional_embedding(x, position_embeddings, max_sequence_length):
    """Mirror of LearnablePositionalEmbedding.forward.

    x:                    (bs, seq_length, hidden_dim)  -- only shape is used
    position_embeddings:  (1, max_sequence_length, hidden_dim)
    returns:              (bs, seq_length, hidden_dim), dtype of the table.

    NOTE: prefer `add_positional_embedding` at use sites that immediately add
    the result to x — it is ~2x cheaper in HBM traffic.
    """
    bs, seq_length, hidden_dim = x.shape
    if seq_length > max_sequence_length:
        raise ValueError(
            f"Sequence length ({seq_length}) exceeds maximum length "
            f"({max_sequence_length})")

    pos = position_embeddings[:, :seq_length, :]          # static slice: plain JAX glue
    dtype = pos.dtype
    budget, limit = _vmem_budgets()

    if hidden_dim % 128 != 0:
        flat = seq_length * hidden_dim
        if _flat_path_fits(bs, flat, dtype.itemsize, 1, budget):
            out = _broadcast_2d(pos.reshape(1, flat), bs, budget, limit)
            return out.reshape(bs, seq_length, hidden_dim)
    return _broadcast_3d(pos, bs, budget, limit)


def add_positional_embedding(x, position_embeddings, max_sequence_length):
    """Fused `x + position_embeddings[:, :S, :]` (preferred: avoids materializing
    the broadcast, ~2x less HBM traffic)."""
    bs, seq_length, hidden_dim = x.shape
    if seq_length > max_sequence_length:
        raise ValueError(
            f"Sequence length ({seq_length}) exceeds maximum length "
            f"({max_sequence_length})")

    # Cast the table once outside the kernel (halves pos DMA for bf16 x and
    # removes per-element promote/demote on the VPU).
    pos = position_embeddings[:, :seq_length, :].astype(x.dtype)
    budget, limit = _vmem_budgets()

    if hidden_dim % 128 != 0:
        flat = seq_length * hidden_dim
        if _flat_path_fits(bs, flat, x.dtype.itemsize, 2, budget):
            out = _add_2d(x.reshape(bs, flat), pos.reshape(1, flat), budget, limit)
            return out.reshape(bs, seq_length, hidden_dim)
    return _add_3d(x, pos, budget, limit)


def init_position_embeddings(key, max_sequence_length, hidden_dim, std=0.02):
    # nn.init.trunc_normal_(std=0.02) truncates at +/- 2 std.
    return std * jax.random.truncated_normal(
        key, -2.0, 2.0, (1, max_sequence_length, hidden_dim), jnp.float32)


if __name__ == "__main__":
    key = jax.random.PRNGKey(0)
    k_pos, k_x, k_pos2, k_x2 = jax.random.split(key, 4)

    # Narrow hidden dim: exercises the lane-dense flattened (2-D) path.
    max_seq, D, bs, S = 16, 32, 2, 8
    pos_tbl = init_position_embeddings(k_pos, max_seq, D)
    x = jax.random.normal(k_x, (bs, S, D), jnp.float32)

    out = jax.block_until_ready(learnable_positional_embedding(x, pos_tbl, max_seq))
    ref = jnp.broadcast_to(pos_tbl[:, :S, :], (bs, S, D))
    assert out.shape == (bs, S, D)
    assert jnp.allclose(out, ref)

    fused = jax.block_until_ready(add_positional_embedding(x, pos_tbl, max_seq))
    assert jnp.allclose(fused, x + ref, atol=1e-6)

    # Wide hidden dim: exercises the 3-D tiled path (D % 128 == 0), bf16 x.
    max_seq2, D2, bs2, S2 = 16, 128, 2, 8
    pos_tbl2 = init_position_embeddings(k_pos2, max_seq2, D2)
    x2 = jax.random.normal(k_x2, (bs2, S2, D2)).astype(jnp.bfloat16)

    out2 = jax.block_until_ready(learnable_positional_embedding(x2, pos_tbl2, max_seq2))
    ref2 = jnp.broadcast_to(pos_tbl2[:, :S2, :], (bs2, S2, D2))
    assert jnp.allclose(out2, ref2)

    fused2 = jax.block_until_ready(add_positional_embedding(x2, pos_tbl2, max_seq2))
    ref2_add = x2 + pos_tbl2[:, :S2, :].astype(jnp.bfloat16)
    assert jnp.allclose(fused2.astype(jnp.float32), ref2_add.astype(jnp.float32),
                        atol=1e-2)

    print("KERNEL_OK")
</pallas_src>

<mosaic_0001>
module attributes {stable_mosaic.version = 11 : i64} {
  func.func @_broadcast_kernel(%arg0: i32, %arg1: memref<1x256xf32, #tpu.memory_space<vmem>>, %arg2: memref<2x256xf32, #tpu.memory_space<vmem>>) attributes {dimension_semantics = [#tpu.dimension_semantics<parallel>], iteration_bounds = array<i64: 1>, scalar_prefetch = 0 : i64, scratch_operands = 0 : i64, tpu.core_type = #tpu.core_type<tc>, window_params = [{transform_indices = @transform_0, window_bounds = array<i64: 1, 256>}, {transform_indices = @transform_1, window_bounds = array<i64: 2, 256>}]} {
    %c0 = arith.constant 0 : index
    %c0_0 = arith.constant 0 : index
    %0 = vector.load %arg1[%c0, %c0_0] : memref<1x256xf32, #tpu.memory_space<vmem>>, vector<1x256xf32>
    %1 = vector.shape_cast %0 : vector<1x256xf32> to vector<1x256xf32>
    %2 = vector.broadcast %1 : vector<1x256xf32> to vector<2x256xf32>
    %c0_1 = arith.constant 0 : index
    %c0_2 = arith.constant 0 : index
    %3 = vector.load %arg2[%c0_1, %c0_2] : memref<2x256xf32, #tpu.memory_space<vmem>>, vector<2x256xf32>
    tpu.vector_store %arg2[%c0_1, %c0_2], %2 {strides = array<i32>} : memref<2x256xf32, #tpu.memory_space<vmem>>, vector<2x256xf32>,
    return
  }
  func.func @transform_0(%arg0: i32) -> (i32, i32) {
    %c0_i32 = arith.constant 0 : i32
    %c0_i32_0 = arith.constant 0 : i32
    return %c0_i32, %arg0 : i32, i32
  }
  func.func @transform_1(%arg0: i32) -> (i32, i32) {
    %c0_i32 = arith.constant 0 : i32
    %c0_i32_0 = arith.constant 0 : i32
    return %c0_i32, %arg0 : i32, i32
  }
}

</mosaic_0001>

<bundles_post_ra>
// kernel: tpu_custom_call.1
= control target key start
LH: loop header
LB: loop body
LE: loop exit
PB: predicated region body
PF: predicated region fallthrough
CT: control target
= control target key end

     0   :  { %6 = vsyncpa [#allocation3], 0  ;;  %s143_s0 = inlined_call_operand.hbm [shape: f32[1,256], index: 0, kind: input, shape index: {}]   ;;  %s144_s1 = inlined_call_operand.hbm [shape: f32[2,256], index: 1, kind: output, shape index: {}]  }
   0x1   :  { %7 = vsyncpa [#allocation4], 0  ;;  %s107_s6 = smov [#allocation2]   ;;  %s59_s10 = scalar_lea.hbm %s143_s0, 32 }
   0x2   :  { %s14_s7 = sshll.u32 %s107_s6, 4  ;;  %p60_p0 = scmp.ne.s32.totalorder %s143_s0, %s59_s10  ;;  %s15_s7 = int_to_ptr.vmem [resolvable:$true] %s14_s7 }
   0x3   :  { %p63_p1 = scmp.lt.u32.totalorder %s59_s10, %s143_s0 }
   0x5   :  { %p65_p2 = pnand %p63_p1, %p60_p0 }
   0x7   :  { %68 = shalt.err (!%p65_p2)
}
   0x8   :  { %s69_s15 = scalar_lea.vmem %s15_s7, 32  ;;  %p74_p4 = scmp.lt.s32.totalorder %s15_s7, %s15_s7 }
   0x9   :  { %p70_p3 = scmp.ne.s32.totalorder %s15_s7, %s69_s15  ;;  %p75_p5 = scmp.lt.s32.totalorder %s69_s15, %s69_s15 }
   0xb   :  { %p76_p6 = por %p75_p5, %p74_p4 }
   0xd   :  { %p77_p7 = pnand %p76_p6, %p70_p3 }
   0xf   :  { %80 = shalt.err (!%p77_p7)
}
  0x10   :  { %17 = dma.hbm_to_vmem [thread:$0]  %s143_s0, 32, %s15_s7, [#allocation3]  }
  0x11   :  { %103 = dma.done.wait [#allocation3], 32  }
  0x12   :  { %104 = vsyncadd [#allocation3], 4294967264  ;;  %v23_v0 = vlaneseq  ;;  %v21_v4 = vld [vmem:[#allocation2] sm:$0x3]  ;;  %s108_s18 = smov [#allocation5]  }
  0x13   :  { %s47_s19 = sshll.u32 %s108_s18, 4  ;;  %s48_s19 = int_to_ptr.vmem [resolvable:$true] %s47_s19 }
  0x14   :  { %v24_v1 = vshrl.u32 %v23_v0, 7  ;;  %s81_s20 = scalar_lea.vmem %s48_s19, 64  ;;  %p86_p9 = scmp.lt.s32.totalorder %s48_s19, %s48_s19 }
  0x15   :  { %p82_p8 = scmp.ne.s32.totalorder %s48_s19, %s81_s20  ;;  %p87_p10 = scmp.lt.s32.totalorder %s81_s20, %s81_s20 }
  0x16   :  { %v25_v2 = vsub.s32 0, %v24_v1  ;;  %v29_v3 = vsub.s32 1, %v24_v1 }
  0x17   :  { %p88_p11 = por %p87_p10, %p86_p9 }
  0x18   :  { %v26_v5 = vrot.slane %v21_v4, %v25_v2  ;;  %v30_v6 = vrot.slane %v21_v4, %v29_v3 }
  0x19   :  { %p89_p12 = pnand %p88_p11, %p82_p8 }
  0x1a   :  { %v31_v7 = vcombine.low %v26_v5, %v30_v6 }
  0x1c   :  { %56 = vst.sshfl [vmem:[#allocation5] sm:$0x33 pattern:$0x76325410] %v31_v7 }
  0x1d   :  { %92 = shalt.err (!%p89_p12)
}
  0x1e   :  { %s93_s22 = scalar_lea.hbm %s144_s1, 64 }
  0x1f   :  { %p94_p13 = scmp.ne.s32.totalorder %s144_s1, %s93_s22  ;;  %p97_p0 = scmp.lt.u32.totalorder %s93_s22, %s144_s1 }
  0x21   :  { %p99_p1 = pnand %p97_p0, %p94_p13 }
  0x23   :  { %102 = shalt.err (!%p99_p1)
}
  0x24   :  { %50 = dma.vmem_to_hbm [thread:$0]  %s48_s19, 64, %s144_s1, [#allocation4]  }
  0x25   :  { %105 = dma.done.wait [#allocation4], 64  }
  0x26   :  { %106 = vsyncadd [#allocation4], 4294967232 }
  0x27   :  { %54 = vsyncpa [#allocation3], 1 }
  0x28   :  { %55 = vsyncpa [#allocation4], 1 }

</bundles_post_ra>
